<compile_context>
chip_gen: v6e
topology: v6e:2x2x1
jax: 0.10.0
libtpu: 0.0.40
codegen_flags: <defaults>
</compile_context>

<pallas_src>
import functools

import jax
import jax.numpy as jnp
from jax.experimental import pallas as pl
from jax.experimental.pallas import tpu as pltpu


def _round_up(x: int, m: int) -> int:
    return ((x + m - 1) // m) * m


def pg_kernel(x_ref, w1_ref, w2_ref, wh_ref, bias_ref, out_ref, *, H1, H2, O):
    """Fused MLP trunk + policy/value heads for one batch tile.

    x_ref   : (tm, D)       observation tile
    w1_ref  : (D, H1)       trunk layer 1 weights (features-last)
    w2_ref  : (H1, H2)      trunk layer 2 weights
    wh_ref  : (H2, O+1)     fused head weights [Wpi | Wv]
    bias_ref: (8, BPAD)     row 0 = b1, row 1 = b2, row 2 = [bpi | bv]
    out_ref : (tm, O+1)     columns [0:O] = pi, column O = v
    """
    # Static ref slices on the packed bias block (cheap partial-tile loads).
    b1 = bias_ref[0:1, 0:H1]
    b2 = bias_ref[1:2, 0:H2]
    bh = bias_ref[2:3, 0:O + 1]

    # Shared trunk, fully inlined; activations stay in vregs (no scratch).
    h1 = jnp.dot(x_ref[...], w1_ref[...], preferred_element_type=jnp.float32)
    h1 = jnp.maximum(h1 + b1, 0.0)
    h2 = jnp.dot(h1, w2_ref[...], preferred_element_type=jnp.float32)
    h2 = jnp.maximum(h2 + b2, 0.0)

    # One MXU pass for both heads: (tm, H2) @ (H2, O+1).
    heads = jnp.dot(h2, wh_ref[...], preferred_element_type=jnp.float32) + bh

    # Masked softmax over the first O lanes; lane O (the value) passes through.
    # No slicing / concatenation: everything operates on the full (tm, O+1) vreg
    # and the result is written with a single store.
    col = jax.lax.broadcasted_iota(jnp.int32, heads.shape, 1)
    is_pi = col < O
    m = jnp.max(jnp.where(is_pi, heads, -jnp.inf), axis=-1, keepdims=True)
    e = jnp.where(is_pi, jnp.exp(heads - m), 0.0)
    s = jnp.sum(e, axis=-1, keepdims=True)
    out_ref[...] = jnp.where(is_pi, e / s, heads)


def mlp_pg_forward(obs, w1, b1, w2, b2, wpi, bpi, wv, bv):
    """obs: (B, input_size) float32. Returns (pi: (B, O), v: (B,)).

    Weights are features-last: W is (in_features, out_features), b is (out,).
    """
    obs = obs.astype(jnp.float32)
    B, D = obs.shape
    H1 = w1.shape[1]
    H2 = w2.shape[1]
    O = wpi.shape[1]
    OV = O + 1  # fused head width: O policy logits + 1 value

    # ---- one-time operand packing (layout plumbing, done outside the kernel) ----
    # Fused head weights: [Wpi | Wv] -> (H2, O+1).
    w_heads = jnp.concatenate([wpi, wv.reshape(H2, 1)], axis=1)

    # Single lane-aligned bias block (8 sublanes x BPAD lanes).
    BPAD = max(128, _round_up(max(H1, H2, OV), 128))
    bias_blk = jnp.zeros((8, BPAD), dtype=jnp.float32)
    bias_blk = bias_blk.at[0, :H1].set(b1.astype(jnp.float32))
    bias_blk = bias_blk.at[1, :H2].set(b2.astype(jnp.float32))
    bias_blk = bias_blk.at[2, :OV].set(
        jnp.concatenate([bpi, bv.reshape(1)]).astype(jnp.float32))

    # ---- batch tiling: grid over T*B, weights resident across all steps ----
    tm = 256 if B > 256 else _round_up(B, 8)     # rows per grid step
    B_pad = _round_up(B, tm)
    if B_pad != B:
        obs = jnp.pad(obs, ((0, B_pad - B), (0, 0)))
    grid = (B_pad // tm,)

    kernel = functools.partial(pg_kernel, H1=H1, H2=H2, O=O)

    out = pl.pallas_call(
        kernel,
        out_shape=jax.ShapeDtypeStruct((B_pad, OV), jnp.float32),
        grid=grid,
        in_specs=[
            pl.BlockSpec((tm, D), lambda i: (i, 0)),        # obs tile (pipelined)
            pl.BlockSpec((D, H1), lambda i: (0, 0)),        # W1      (resident)
            pl.BlockSpec((H1, H2), lambda i: (0, 0)),       # W2      (resident)
            pl.BlockSpec((H2, OV), lambda i: (0, 0)),       # W_heads (resident)
            pl.BlockSpec((8, BPAD), lambda i: (0, 0)),      # biases  (resident)
        ],
        out_specs=pl.BlockSpec((tm, OV), lambda i: (i, 0)),  # fused [pi | v]
        compiler_params=pltpu.CompilerParams(
            dimension_semantics=("parallel",)),              # v7x: shard batch over 2 TCs
    )(obs, w1.astype(jnp.float32), w2.astype(jnp.float32), w_heads, bias_blk)

    # Split the fused output; restore_leading_dims with lead_dim=1 is identity.
    pi = out[:B, :O]
    v = out[:B, O]
    return pi, v


if __name__ == "__main__":
    # Small, module-consistent shapes (B is the leading T*B dim with T=1).
    B = 8
    input_size = 32
    hidden_sizes = [64, 64]
    output_size = 4

    H1, H2 = hidden_sizes
    key = jax.random.PRNGKey(0)
    k_obs, k_w1, k_b1, k_w2, k_b2, k_wpi, k_bpi, k_wv, k_bv = jax.random.split(key, 9)

    obs = jax.random.normal(k_obs, (B, input_size), dtype=jnp.float32)

    # Deterministic synthetic parameters in features-last layout:
    # W is (in_features, out_features) (PyTorch Linear weight transposed), b is (out,).
    def init_w(k, shape):
        fan_in = shape[0]
        return jax.random.normal(k, shape, dtype=jnp.float32) / jnp.sqrt(fan_in)

    w1 = init_w(k_w1, (input_size, H1))
    b1 = 0.01 * jax.random.normal(k_b1, (H1,), dtype=jnp.float32)
    w2 = init_w(k_w2, (H1, H2))
    b2 = 0.01 * jax.random.normal(k_b2, (H2,), dtype=jnp.float32)
    wpi = init_w(k_wpi, (H2, output_size))
    bpi = 0.01 * jax.random.normal(k_bpi, (output_size,), dtype=jnp.float32)
    wv = init_w(k_wv, (H2, 1))
    bv = 0.01 * jax.random.normal(k_bv, (1,), dtype=jnp.float32)

    pi, v = mlp_pg_forward(obs, w1, b1, w2, b2, wpi, bpi, wv, bv)
    pi, v = jax.block_until_ready((pi, v))

    # Pure-JAX reference.
    h1 = jnp.maximum(obs @ w1 + b1, 0.0)
    h2 = jnp.maximum(h1 @ w2 + b2, 0.0)
    pi_ref = jax.nn.softmax(h2 @ wpi + bpi, axis=-1)
    v_ref = (h2 @ wv + bv).reshape(B)

    assert pi.shape == (B, output_size)
    assert v.shape == (B,)
    # Exact softmax divide -> tight tolerances for both heads.
    assert jnp.allclose(pi, pi_ref, atol=1e-5, rtol=1e-5), "pi mismatch vs reference"
    assert jnp.allclose(v, v_ref, atol=1e-5, rtol=1e-5), "v mismatch vs reference"

    print("KERNEL_OK")
</pallas_src>

<mosaic_0001>
module attributes {stable_mosaic.version = 11 : i64} {
  func.func @pg_kernel(%arg0: i32, %arg1: memref<8x32xf32, #tpu.memory_space<vmem>>, %arg2: memref<32x64xf32, #tpu.memory_space<vmem>>, %arg3: memref<64x64xf32, #tpu.memory_space<vmem>>, %arg4: memref<64x5xf32, #tpu.memory_space<vmem>>, %arg5: memref<8x128xf32, #tpu.memory_space<vmem>>, %arg6: memref<8x5xf32, #tpu.memory_space<vmem>>) attributes {dimension_semantics = [#tpu.dimension_semantics<parallel>], iteration_bounds = array<i64: 1>, scalar_prefetch = 0 : i64, scratch_operands = 0 : i64, tpu.core_type = #tpu.core_type<tc>, window_params = [{transform_indices = @transform_0, window_bounds = array<i64: 8, 32>}, {pipeline_mode = #tpu.pipeline_mode<synchronous>, transform_indices = @transform_1, window_bounds = array<i64: 32, 64>}, {pipeline_mode = #tpu.pipeline_mode<synchronous>, transform_indices = @transform_2, window_bounds = array<i64: 64, 64>}, {pipeline_mode = #tpu.pipeline_mode<synchronous>, transform_indices = @transform_3, window_bounds = array<i64: 64, 5>}, {pipeline_mode = #tpu.pipeline_mode<synchronous>, transform_indices = @transform_4, window_bounds = array<i64: 8, 128>}, {transform_indices = @transform_5, window_bounds = array<i64: 8, 5>}]} {
    %c0 = arith.constant 0 : index
    %c0_0 = arith.constant 0 : index
    %0 = vector.load %arg5[%c0, %c0_0] : memref<8x128xf32, #tpu.memory_space<vmem>>, vector<1x64xf32>
    %c1 = arith.constant 1 : index
    %c0_1 = arith.constant 0 : index
    %1 = vector.load %arg5[%c1, %c0_1] : memref<8x128xf32, #tpu.memory_space<vmem>>, vector<1x64xf32>
    %c2 = arith.constant 2 : index
    %c0_2 = arith.constant 0 : index
    %2 = vector.load %arg5[%c2, %c0_2] : memref<8x128xf32, #tpu.memory_space<vmem>>, vector<1x5xf32>
    %c0_3 = arith.constant 0 : index
    %c0_4 = arith.constant 0 : index
    %3 = vector.load %arg1[%c0_3, %c0_4] : memref<8x32xf32, #tpu.memory_space<vmem>>, vector<8x32xf32>
    %c0_5 = arith.constant 0 : index
    %c0_6 = arith.constant 0 : index
    %4 = vector.load %arg2[%c0_5, %c0_6] : memref<32x64xf32, #tpu.memory_space<vmem>>, vector<32x64xf32>
    %cst = arith.constant dense<0.000000e+00> : vector<8x64xf32>
    %5 = tpu.matmul %3, %4, %cst {dimension_numbers = #tpu.dot_dimension_numbers<[1], [0], [0], [1], [0, 0, 1, 1], [], []>} : vector<8x32xf32>, vector<32x64xf32>, vector<8x64xf32> -> vector<8x64xf32>
    %6 = vector.broadcast %0 : vector<1x64xf32> to vector<8x64xf32>
    %7 = arith.addf %5, %6 : vector<8x64xf32>
    %cst_7 = arith.constant 0.000000e+00 : f32
    %8 = vector.broadcast %cst_7 : f32 to vector<8x64xf32>
    %9 = arith.maximumf %7, %8 : vector<8x64xf32>
    %c0_8 = arith.constant 0 : index
    %c0_9 = arith.constant 0 : index
    %10 = vector.load %arg3[%c0_8, %c0_9] : memref<64x64xf32, #tpu.memory_space<vmem>>, vector<64x64xf32>
    %cst_10 = arith.constant dense<0.000000e+00> : vector<8x64xf32>
    %11 = tpu.matmul %9, %10, %cst_10 {dimension_numbers = #tpu.dot_dimension_numbers<[1], [0], [0], [1], [0, 0, 1, 1], [], []>} : vector<8x64xf32>, vector<64x64xf32>, vector<8x64xf32> -> vector<8x64xf32>
    %12 = vector.broadcast %1 : vector<1x64xf32> to vector<8x64xf32>
    %13 = arith.addf %11, %12 : vector<8x64xf32>
    %cst_11 = arith.constant 0.000000e+00 : f32
    %14 = vector.broadcast %cst_11 : f32 to vector<8x64xf32>
    %15 = arith.maximumf %13, %14 : vector<8x64xf32>
    %c0_12 = arith.constant 0 : index
    %c0_13 = arith.constant 0 : index
    %16 = vector.load %arg4[%c0_12, %c0_13] : memref<64x5xf32, #tpu.memory_space<vmem>>, vector<64x5xf32>
    %cst_14 = arith.constant dense<0.000000e+00> : vector<8x5xf32>
    %17 = tpu.matmul %15, %16, %cst_14 {dimension_numbers = #tpu.dot_dimension_numbers<[1], [0], [0], [1], [0, 0, 1, 1], [], []>} : vector<8x64xf32>, vector<64x5xf32>, vector<8x5xf32> -> vector<8x5xf32>
    %18 = vector.broadcast %2 : vector<1x5xf32> to vector<8x5xf32>
    %19 = arith.addf %17, %18 : vector<8x5xf32>
    %20 = tpu.iota {dimensions = array<i32: 1>} : vector<8x5xi32>
    %c4_i32 = arith.constant 4 : i32
    %21 = vector.broadcast %c4_i32 : i32 to vector<8x5xi32>
    %22 = arith.cmpi slt, %20, %21 : vector<8x5xi32>
    %cst_15 = arith.constant 0xFF800000 : f32
    %23 = vector.broadcast %cst_15 : f32 to vector<8x5xf32>
    %24 = arith.select %22, %19, %23 : vector<8x5xi1>, vector<8x5xf32>
    %cst_16 = arith.constant dense<0xFF800000> : vector<8xf32>
    %25 = vector.multi_reduction <maximumf>, %24, %cst_16 [1] : vector<8x5xf32> to vector<8xf32>
    %26 = vector.shape_cast %25 : vector<8xf32> to vector<8x1xf32>
    %27 = vector.broadcast %26 : vector<8x1xf32> to vector<8x5xf32>
    %28 = arith.subf %19, %27 : vector<8x5xf32>
    %29 = math.exp %28 : vector<8x5xf32>
    %cst_17 = arith.constant 0.000000e+00 : f32
    %30 = vector.broadcast %cst_17 : f32 to vector<8x5xf32>
    %31 = arith.select %22, %29, %30 : vector<8x5xi1>, vector<8x5xf32>
    %cst_18 = arith.constant dense<0.000000e+00> : vector<8xf32>
    %32 = vector.multi_reduction <add>, %31, %cst_18 [1] : vector<8x5xf32> to vector<8xf32>
    %33 = vector.shape_cast %32 : vector<8xf32> to vector<8x1xf32>
    %34 = vector.broadcast %33 : vector<8x1xf32> to vector<8x5xf32>
    %35 = arith.divf %31, %34 : vector<8x5xf32>
    %36 = arith.select %22, %35, %19 : vector<8x5xi1>, vector<8x5xf32>
    %c0_19 = arith.constant 0 : index
    %c0_20 = arith.constant 0 : index
    %37 = vector.load %arg6[%c0_19, %c0_20] : memref<8x5xf32, #tpu.memory_space<vmem>>, vector<8x5xf32>
    tpu.vector_store %arg6[%c0_19, %c0_20], %36 {strides = array<i32>} : memref<8x5xf32, #tpu.memory_space<vmem>>, vector<8x5xf32>,
    return
  }
  func.func @transform_0(%arg0: i32) -> (i32, i32) {
    %c0_i32 = arith.constant 0 : i32
    %c0_i32_0 = arith.constant 0 : i32
    return %arg0, %c0_i32 : i32, i32
  }
  func.func @transform_1(%arg0: i32) -> (i32, i32) {
    %c0_i32 = arith.constant 0 : i32
    %c0_i32_0 = arith.constant 0 : i32
    %c0_i32_1 = arith.constant 0 : i32
    return %c0_i32, %c0_i32_0 : i32, i32
  }
  func.func @transform_2(%arg0: i32) -> (i32, i32) {
    %c0_i32 = arith.constant 0 : i32
    %c0_i32_0 = arith.constant 0 : i32
    %c0_i32_1 = arith.constant 0 : i32
    return %c0_i32, %c0_i32_0 : i32, i32
  }
  func.func @transform_3(%arg0: i32) -> (i32, i32) {
    %c0_i32 = arith.constant 0 : i32
    %c0_i32_0 = arith.constant 0 : i32
    %c0_i32_1 = arith.constant 0 : i32
    return %c0_i32, %c0_i32_0 : i32, i32
  }
  func.func @transform_4(%arg0: i32) -> (i32, i32) {
    %c0_i32 = arith.constant 0 : i32
    %c0_i32_0 = arith.constant 0 : i32
    %c0_i32_1 = arith.constant 0 : i32
    return %c0_i32, %c0_i32_0 : i32, i32
  }
  func.func @transform_5(%arg0: i32) -> (i32, i32) {
    %c0_i32 = arith.constant 0 : i32
    %c0_i32_0 = arith.constant 0 : i32
    return %arg0, %c0_i32 : i32, i32
  }
}

</mosaic_0001>

<bundles_post_ra>
// kernel: tpu_custom_call.1
= control target key start
LH: loop header
LB: loop body
LE: loop exit
PB: predicated region body
PF: predicated region fallthrough
CT: control target
= control target key end

     0   :  { %10 = vsyncpa [#allocation3], 0  ;;  %s627_s0 = inlined_call_operand.vmem [shape: f32[8,32], index: 0, kind: input, shape index: {}]   ;;  %s628_s1 = inlined_call_operand.hbm [shape: f32[32,64], index: 1, kind: input, shape index: {}]   ;;  %s629_s2 = inlined_call_operand.vmem [shape: f32[64,64], index: 2, kind: input, shape index: {}]   ;;  %s630_s3 = inlined_call_operand.vmem [shape: f32[64,5], index: 3, kind: input, shape index: {}]   ;;  %s631_s4 = inlined_call_operand.hbm [shape: f32[8,128], index: 4, kind: input, shape index: {}]   ;;  %s632_s5 = inlined_call_operand.hbm [shape: f32[8,5], index: 5, kind: output, shape index: {}]  }
   0x1   :  { %11 = vsyncpa [#allocation6], 0 }
   0x2   :  { %12 = vsyncpa [#allocation4], 0  ;;  %s496_s18 = smov [#allocation2]  }
   0x3   :  { %s20_s19 = sshll.u32 %s496_s18, 4  ;;  %s21_s19 = int_to_ptr.vmem [resolvable:$true] %s20_s19 }
   0x4   :  { %s438_s20 = scalar_lea.vmem %s21_s19, 512  ;;  %p443_p1 = scmp.lt.s32.totalorder %s21_s19, %s21_s19 }
   0x5   :  { %p439_p0 = scmp.ne.s32.totalorder %s21_s19, %s438_s20  ;;  %p444_p2 = scmp.lt.s32.totalorder %s438_s20, %s438_s20 }
   0x7   :  { %p445_p3 = por %p444_p2, %p443_p1 }
   0x9   :  { %p446_p4 = pnand %p445_p3, %p439_p0 }
   0xb   :  { %449 = shalt.err (!%p446_p4)
}
   0xc   :  { %s497_s21 = smov 128   ;;  %s498_s22 = smov 8  }
   0xd   :  { %26 = dma.hbm_to_vmem [thread:$0]  %s628_s1, 512, %s21_s19, [#allocation3], %s497_s21, %s497_s21, %s498_s22  }
   0xe   :  { %s499_s25 = smov [#allocation5]  }
   0xf   :  { %s37_s26 = sshll.u32 %s499_s25, 4  ;;  %s38_s26 = int_to_ptr.vmem [resolvable:$true] %s37_s26 }
  0x10   :  { %s458_s27 = scalar_lea.vmem %s38_s26, 128  ;;  %p463_p6 = scmp.lt.s32.totalorder %s38_s26, %s38_s26 }
  0x11   :  { %p459_p5 = scmp.ne.s32.totalorder %s38_s26, %s458_s27  ;;  %p464_p7 = scmp.lt.s32.totalorder %s458_s27, %s458_s27 }
  0x13   :  { %p465_p8 = por %p464_p7, %p463_p6 }
  0x15   :  { %p466_p9 = pnand %p465_p8, %p459_p5 }
  0x17   :  { %469 = shalt.err (!%p466_p9)
}
  0x18   :  { %40 = dma.hbm_to_vmem [thread:$0]  %s631_s4, 128, %s38_s26, [#allocation6]  }
  0x19   :  { %490 = dma.done.wait [#allocation3], 512  }
  0x1a   :  { %491 = vsyncadd [#allocation3], 4294966784 }
  0x1b   :  { %492 = dma.done.wait [#allocation6], 128  }
  0x1c   :  { %493 = vsyncadd [#allocation6], 4294967168  ;;  %v500_v0 = vmov 0.0   ;;  %vm501_vm0 = vmmov 0   ;;  %v54_v1 = vld [vmem:[#allocation2 + $0x18] sm:$0xff]  ;;  %v53_v2 = vld [vmem:[#allocation2 + $0x10] sm:$0xff]  ;;  %v306_v32 = vlaneseq }
  0x1d   :  { %370 = vmatprep.subr.mxu0 %v500_v0  ;;  %378 = vmatprep.mubr.msk.f32.mxu0 %vm501_vm0, %v500_v0  ;;  %v141_v3 = vld [vmem:[%s629_s2 + $0x38] sm:$0xff]  ;;  %v52_v4 = vld [vmem:[#allocation2 + $0x8] sm:$0xff]  ;;  %v140_v5 = vld [vmem:[%s629_s2 + $0x30] sm:$0xff]  ;;  %vm59_vm1 = vcmask 261120   ;;  %vm146_vm2 = vcmask 523264   ;;  %vm310_vm4 = vcmask 39936  }
  0x1e   :  { %381 = vmatprep.subr.mxu1 %v500_v0  ;;  %397 = vmatprep.mubr.msk.f32.mxu1 %vm501_vm0, %v500_v0  ;;  %v139_v6 = vld [vmem:[%s629_s2 + $0x28] sm:$0xff]  ;;  %v51_v7 = vld [vmem:[#allocation2] sm:$0xff]  ;;  %v137_v10 = vld [vmem:[%s629_s2 + $0x18] sm:$0xff]  ;;  %v307_v33 = vand.u32 127, %v306_v32 }
  0x1f   :  { %371 = vmatpush3.msra.mxu0 %v54_v1  ;;  %382 = vmatpush3.msra.mxu1 %v141_v3  ;;  %v50_v8 = vld [vmem:[%s627_s0] sm:$0xff]  ;;  %v136_v11 = vld [vmem:[%s629_s2 + $0x10] sm:$0xff]  ;;  %v135_v12 = vld [vmem:[%s629_s2 + $0x8] sm:$0xff] }
  0x20   :  { %372 = vmatprep.subr.mxu0 %v500_v0  ;;  %383 = vmatprep.subr.mxu1 %v500_v0  ;;  %v138_v9 = vld [vmem:[%s629_s2 + $0x20] sm:$0xff]  ;;  %v228_v14 = vld [vmem:[%s630_s3 + $0x38] sm:$0xff]  ;;  %v227_v15 = vld [vmem:[%s630_s3 + $0x30] sm:$0xff]  ;;  %vm308_vm3 = vcmp.lt.s32.totalorder %v307_v33, 4 }
  0x21   :  { %373 = vmatpush3.msra.mxu0 %v53_v2  ;;  %384 = vmatpush3.msra.mxu1 %v140_v5  ;;  %v134_v13 = vld [vmem:[%s629_s2] sm:$0xff]  ;;  %v226_v16 = vld [vmem:[%s630_s3 + $0x28] sm:$0xff]  ;;  %v224_v18 = vld [vmem:[%s630_s3 + $0x18] sm:$0xff] }
  0x22   :  { %374 = vmatprep.subr.mxu0 %v500_v0  ;;  %385 = vmatprep.subr.mxu1 %v500_v0  ;;  %v225_v17 = vld [vmem:[%s630_s3 + $0x20] sm:$0xff]  ;;  %v223_v24 = vld [vmem:[%s630_s3 + $0x10] sm:$0xff]  ;;  %v222_v25 = vld [vmem:[%s630_s3 + $0x8] sm:$0xff] }
  0x23   :  { %375 = vmatpush3.msra.mxu0 %v52_v4  ;;  %386 = vmatpush3.msra.mxu1 %v139_v6  ;;  %v341_v19 = vld [vmem:[#allocation5] ss:$0 sm:$0xff]  ;;  %v343_v27 = vld [vmem:[#allocation5 + $0x1] ss:$0 sm:$0xff]  ;;  %v345_v34 = vld [vmem:[#allocation5 + $0x2] ss:$0 sm:$0xff] }
  0x24   :  { %376 = vmatprep.subr.mxu0 %v500_v0  ;;  %387 = vmatprep.subr.mxu1 %v500_v0  ;;  %v221_v26 = vld [vmem:[%s630_s3] sm:$0xff]  ;;  %s502_s3 = smov [#allocation7]  }
  0x25   :  { %377 = vmatpush3.msra.mxu0 %v51_v7  ;;  %388 = vmatpush3.msra.mxu1 %v138_v9  ;;  %s331_s8 = sshll.u32 %s502_s3, 4  ;;  %s332_s8 = int_to_ptr.vmem [resolvable:$true] %s331_s8 }
  0x26   :  { %379 = vmatmul.mubr.msk.f32.vlgmr.msra.gmra.mxu0 %vm59_vm1, %v50_v8  ;;  %389 = vmatprep.subr.mxu1 %v500_v0  ;;  %s470_s9 = scalar_lea.vmem %s332_s8, 128  ;;  %p475_p11 = scmp.lt.s32.totalorder %s332_s8, %s332_s8 }
  0x27   :  { %400 = vmatprep.subr.mxu0 %v500_v0  ;;  %390 = vmatpush3.msra.mxu1 %v137_v10  ;;  %p471_p10 = scmp.ne.s32.totalorder %s332_s8, %s470_s9  ;;  %p476_p12 = scmp.lt.s32.totalorder %s470_s9, %s470_s9 }
  0x28   :  { %416 = vmatprep.mubr.msk.f32.mxu0 %vm501_vm0, %v500_v0  ;;  %391 = vmatprep.subr.mxu1 %v500_v0 }
  0x29   :  { %392 = vmatpush3.msra.mxu1 %v136_v11  ;;  %401 = vmatpush3.msra.mxu0 %v228_v14  ;;  %p477_p13 = por %p476_p12, %p475_p11 }
  0x2a   :  { %393 = vmatprep.subr.mxu1 %v500_v0  ;;  %402 = vmatprep.subr.mxu0 %v500_v0 }
  0x2b   :  { %394 = vmatpush3.msra.mxu1 %v135_v12  ;;  %403 = vmatpush3.msra.mxu0 %v227_v15  ;;  %p478_p0 = pnand %p477_p13, %p471_p10 }
  0x2c   :  { %395 = vmatprep.subr.mxu1 %v500_v0  ;;  %404 = vmatprep.subr.mxu0 %v500_v0 }
  0x2d   :  { %396 = vmatpush3.msra.mxu1 %v134_v13  ;;  %405 = vmatpush3.msra.mxu0 %v226_v16 }
  0x2e   :  { %406 = vmatprep.subr.mxu0 %v500_v0 }
  0x2f   :  { %407 = vmatpush3.msra.mxu0 %v225_v17 }
  0x30   :  { %408 = vmatprep.subr.mxu0 %v500_v0 }
  0x31   :  { %409 = vmatpush3.msra.mxu0 %v224_v18 }
  0x32   :  { %410 = vmatprep.subr.mxu0 %v500_v0 }
  0x33   :  { %411 = vmatpush3.msra.mxu0 %v223_v24 }
  0x34   :  { %412 = vmatprep.subr.mxu0 %v500_v0 }
  0x35   :  { %413 = vmatpush3.msra.mxu0 %v222_v25 }
  0x36   :  { %414 = vmatprep.subr.mxu0 %v500_v0 }
  0x37   :  { %415 = vmatpush3.msra.mxu0 %v221_v26 }
  0xe6   :  { %v129_v20 = vpop.f32.mrf.mxu0 }
  0xe7   :  { %v130_v21 = vadd.f32 %v341_v19, %v129_v20 }
  0xe8   :  { %v380_v22 = vpop.f32.mrf.mxu0 }
  0xe9   :  { %v133_v23 = vmax.f32 %v130_v21, 0.0 }
  0xeb   :  { %398 = vmatmul.mubr.msk.f32.vlgmr.msra.gmra.mxu1 %vm146_vm2, %v133_v23 }
 0x1ab   :  { %v216_v28 = vpop.f32.mrf.mxu1 }
 0x1ac   :  { %v217_v29 = vadd.f32 %v343_v27, %v216_v28 }
 0x1ad   :  { %v399_v30 = vpop.f32.mrf.mxu1 }
 0x1ae   :  { %v220_v31 = vmax.f32 %v217_v29, 0.0 }
 0x1b0   :  { %417 = vmatmul.mubr.msk.f32.vlgmr.msra.gmra.mxu0 %vm146_vm2, %v220_v31 }
 0x270   :  { %v302_v35 = vpop.f32.mrf.mxu0 }
 0x271   :  { %v303_v36 = vadd.f32 %v345_v34, %v302_v35 }
 0x272   :  { %v418_v37 = vpop.f32.mrf.mxu0 }
 0x273   :  { %v309_v38 = vsel %vm308_vm3, %v303_v36, -inf }
 0x274   :  { %v311_v39 = vsel %vm310_vm4, %v309_v38, -inf }
 0x275   :  { %312 = vmax.xlane.f32.xlu0 %v311_v39 }
 0x2fe   :  { %v313_v40 = vpop.xlane.xlu0 %312 }
 0x2ff   :  { %v314_v41 = vsub.f32 %v303_v36, %v313_v40 }
 0x301   :  { %v315_v42 = vmul.f32 1.442695, %v314_v41 }
 0x303   :  { %426 = vpow2.f32 %v315_v42 }
 0x310   :  { %v427_v43 = vpop.eup %426 }
 0x311   :  { %v317_v44 = vsel %vm308_vm3, %v427_v43, 0.0 }
 0x312   :  { %v318_v45 = vsel %vm310_vm4, %v317_v44, 0.0 }
 0x313   :  { %319 = vadd.xlane.f32.xlu0 %v318_v45 }
 0x39c   :  { %v320_v46 = vpop.xlane.xlu0 %319 }
 0x39d   :  { %428 = vrcp.f32 %v320_v46 }
 0x3aa   :  { %v429_v47 = vpop.eup %428 }
 0x3ab   :  { %v322_v48 = vmul.f32 %v429_v47, %v317_v44 }
 0x3ad   :  { %v323_v49 = vsel %vm308_vm3, %v322_v48, %v303_v36 }
 0x3ae   :  { %324 = vst.msk [vmem:[#allocation7] sm:$0xff] %vm310_vm4, %v323_v49 }
 0x3af   :  { %481 = shalt.err (!%p478_p0)
}
 0x3b0   :  { %334 = dma.vmem_to_hbm [thread:$0]  %s332_s8, 128, %s632_s5, [#allocation4]  }
 0x3b1   :  { %494 = dma.done.wait [#allocation4], 128  }
 0x3b2   :  { %495 = vsyncadd [#allocation4], 4294967168 }
 0x3b3   :  { %338 = vsyncpa [#allocation3], 1 }
 0x3b4   :  { %339 = vsyncpa [#allocation6], 1 }
 0x3b5   :  { %340 = vsyncpa [#allocation4], 1 }

</bundles_post_ra>
